<compile_context>
chip_gen: v6e
topology: v6e:2x2x1
jax: 0.10.0
libtpu: 0.0.40
codegen_flags: <defaults>
</compile_context>

<pallas_src>
import functools

import jax
import jax.numpy as jnp
from jax.experimental import pallas as pl
from jax.experimental.pallas import tpu as pltpu


# -----------------------------------------------------------------------------
# Kernels
# -----------------------------------------------------------------------------
def _supcon_mask_kernel(anchor_ref, feat_t_ref, mask_ref, out_ref,
                        m_max, d_sum, ml_sum, m_sum, *,
                        temperature, base_temperature, n_valid):
    """Supervised-contrastive branch, streamed over N-tiles of features^T.

    grid = (B-blocks [parallel], N-blocks [arbitrary / reduction]).
    """
    bi = pl.program_id(0)
    j = pl.program_id(1)
    tb = anchor_ref.shape[0]
    tn = feat_t_ref.shape[1]
    row0 = bi * tb
    col0 = j * tn

    @pl.when(j == 0)
    def _():
        m_max[...] = jnp.full(m_max.shape, -jnp.inf, m_max.dtype)
        d_sum[...] = jnp.zeros(d_sum.shape, d_sum.dtype)
        ml_sum[...] = jnp.zeros(ml_sum.shape, ml_sum.dtype)
        m_sum[...] = jnp.zeros(m_sum.shape, m_sum.dtype)

    # Fold 1/T into the small (tb, C) operand; keep the big operand native dtype.
    anchor = anchor_ref[...] * jnp.asarray(1.0 / temperature, anchor_ref.dtype)
    # Features are pre-transposed to (C, N): canonical (m,k)x(k,n) MXU layout,
    # no per-tile transpose of the streamed RHS.
    s = jax.lax.dot_general(anchor, feat_t_ref[...],
                            (((1,), (0,)), ((), ())),
                            preferred_element_type=jnp.float32)       # (tb, tn) f32
    # Mask arrives as int8 ({0,1}); expand on-chip.
    mtile = mask_ref[...].astype(jnp.float32)

    # Online LSE. The PyTorch reference takes the max over *all* columns (incl.
    # the self diagonal, s_ii >= 0), so zero-valued padded columns never raise it.
    old_max = m_max[...]
    new_max = jnp.maximum(old_max, jnp.max(s, axis=1, keepdims=True))
    corr = jnp.exp(old_max - new_max)
    p = jnp.exp(s - new_max)

    # Diagonal zeroing + column-validity masking only on tiles that need it.
    diag_overlap = jnp.logical_and(col0 < row0 + tb, row0 < col0 + tn)
    has_pad = col0 + tn > n_valid
    needs_lm = jnp.logical_or(diag_overlap, has_pad)

    @pl.when(needs_lm)
    def _():
        rows = row0 + jax.lax.broadcasted_iota(jnp.int32, s.shape, 0)
        cols = col0 + jax.lax.broadcasted_iota(jnp.int32, s.shape, 1)
        keep = jnp.logical_and(rows != cols, cols < n_valid)
        mt = jnp.where(keep, mtile, 0.0)
        d_sum[...] = d_sum[...] * corr + jnp.sum(jnp.where(keep, p, 0.0),
                                                 axis=1, keepdims=True)
        ml_sum[...] += jnp.sum(mt * s, axis=1, keepdims=True)
        m_sum[...] += jnp.sum(mt, axis=1, keepdims=True)

    @pl.when(jnp.logical_not(needs_lm))
    def _():
        d_sum[...] = d_sum[...] * corr + jnp.sum(p, axis=1, keepdims=True)
        ml_sum[...] += jnp.sum(mtile * s, axis=1, keepdims=True)
        m_sum[...] += jnp.sum(mtile, axis=1, keepdims=True)

    m_max[...] = new_max

    @pl.when(j == pl.num_programs(1) - 1)
    def _():
        # Reference parity: log(sum(exp_logits) + 1e-12). Rows whose mask has no
        # positives hit 0/0 -> NaN, exactly like the PyTorch module. Exact divide:
        # this epilogue runs once per row block, so approx reciprocal buys nothing.
        log_denom = jnp.log(d_sum[...] + 1e-12)
        mean_log_prob_pos = (ml_sum[...]
                             - m_sum[...] * (m_max[...] + log_denom)) / m_sum[...]
        out_ref[...] = (-(temperature / base_temperature)) * mean_log_prob_pos


def _supcon_infonce_kernel(q_ref, lpos_ref, queue_t_ref, out_ref,
                           m_max, d_sum, *, temperature, k_valid):
    """MoCo-style InfoNCE branch. l_pos (already /T, computed in the wrapper)
    initializes the running max / exp-sum; queue^T is streamed over K-tiles."""
    j = pl.program_id(1)
    tk = queue_t_ref.shape[1]
    col0 = j * tk

    @pl.when(j == 0)
    def _():
        m_max[...] = lpos_ref[...]                          # running max starts at l_pos
        d_sum[...] = jnp.ones(d_sum.shape, d_sum.dtype)     # exp(l_pos - l_pos)

    q = q_ref[...] * jnp.asarray(1.0 / temperature, q_ref.dtype)
    s = jax.lax.dot_general(q, queue_t_ref[...],
                            (((1,), (0,)), ((), ())),
                            preferred_element_type=jnp.float32)       # (tb, tk) f32
    old_max = m_max[...]
    has_pad = col0 + tk > k_valid

    @pl.when(has_pad)
    def _():
        cols = col0 + jax.lax.broadcasted_iota(jnp.int32, s.shape, 1)
        valid = cols < k_valid
        tile_max = jnp.max(jnp.where(valid, s, -jnp.inf), axis=1, keepdims=True)
        new_max = jnp.maximum(old_max, tile_max)
        p = jnp.where(valid, jnp.exp(s - new_max), 0.0)
        d_sum[...] = (d_sum[...] * jnp.exp(old_max - new_max)
                      + jnp.sum(p, axis=1, keepdims=True))
        m_max[...] = new_max

    @pl.when(jnp.logical_not(has_pad))
    def _():
        new_max = jnp.maximum(old_max, jnp.max(s, axis=1, keepdims=True))
        d_sum[...] = (d_sum[...] * jnp.exp(old_max - new_max)
                      + jnp.sum(jnp.exp(s - new_max), axis=1, keepdims=True))
        m_max[...] = new_max

    @pl.when(j == pl.num_programs(1) - 1)
    def _():
        # cross_entropy(logits=[l_pos, l_neg], label=0) = lse(logits) - l_pos
        out_ref[...] = m_max[...] + jnp.log(d_sum[...]) - lpos_ref[...]


# -----------------------------------------------------------------------------
# Wrapper (mirrors the PyTorch module's forward)
# -----------------------------------------------------------------------------
def _round_up(x, m):
    return ((x + m - 1) // m) * m


def _row_align(dtype):
    # Sub-32-bit dtypes pack along sublanes: 16-row blocks for bf16, 32 for int8.
    return {4: 8, 2: 16, 1: 32}.get(jnp.dtype(dtype).itemsize, 8)


def _tile_and_pad(size, target, align, min_blocks=1):
    """Pick an aligned block size along one dim and the padded extent.

    Returns (tile, padded) with padded % tile == 0 and tile % align == 0.
    `min_blocks > 1` caps the tile so the dim splits into at least that many
    blocks (when large enough) — used on v7x so both TensorCores get work.
    """
    if min_blocks > 1 and size > align:
        target = min(target, _round_up(-(-size // min_blocks), align))
    tile = min(_round_up(size, align), max(align, (target // align) * align))
    padded = _round_up(size, tile)
    return tile, padded


def _pad_to(x, rows, cols=None):
    pr = rows - x.shape[0]
    pc = 0 if cols is None else cols - x.shape[1]
    if pr == 0 and pc == 0:
        return x
    return jnp.pad(x, ((0, pr), (0, pc)))


def _tpu_kind():
    try:
        return jax.devices()[0].device_kind.lower()
    except Exception:
        return ""


class SupConLoss:
    """Pallas-TPU forward of the PyTorch SupConLoss module.

    Tile / VMEM defaults are generation-aware:
      * v5e / v6e (128 MiB physical VMEM): 512-row blocks + 64 MiB scoped limit —
        larger row blocks cut redundant re-streams of the contrast features.
      * v7x (64 MiB physical): conservative 256x512 blocks + 32 MiB limit, and at
        least two row blocks so both TensorCores are busy on the parallel axis.
    Pass explicit block_rows / block_cols / vmem_limit_bytes to override.
    """

    def __init__(self, temperature=0.07, base_temperature=0.07,
                 block_rows=None, block_cols=None, vmem_limit_bytes=None,
                 min_row_blocks=None):
        self.temperature = float(temperature)
        self.base_temperature = float(base_temperature)
        is_v7 = "v7" in _tpu_kind()
        self.block_rows = (int(block_rows) if block_rows is not None
                           else (256 if is_v7 else 512))
        self.block_cols = int(block_cols) if block_cols is not None else 512
        self.vmem_limit_bytes = (int(vmem_limit_bytes) if vmem_limit_bytes is not None
                                 else (32 if is_v7 else 64) * 1024 * 1024)
        self.min_row_blocks = (int(min_row_blocks) if min_row_blocks is not None
                               else (2 if is_v7 else 1))

    def _compiler_params(self):
        return pltpu.CompilerParams(
            # Row-block axis shards across v7x's two TensorCores; the reduction
            # axis over the contrast/queue tiles must stay "arbitrary".
            dimension_semantics=("parallel", "arbitrary"),
            vmem_limit_bytes=self.vmem_limit_bytes)

    def __call__(self, features, mask=None, batch_size=-1):
        n, c = features.shape
        if mask is not None:
            anchor = features[:batch_size]
            b = anchor.shape[0]
            tb, bp = _tile_and_pad(b, self.block_rows, _row_align(features.dtype),
                                   self.min_row_blocks)
            tn, np_ = _tile_and_pad(n, self.block_cols, 128)
            anchor_p = _pad_to(anchor, bp)
            # One-time XLA transpose so the streamed MXU RHS contracts on its
            # first (sublane) dim — no per-tile XLU transpose in the inner loop.
            feats_t_p = _pad_to(features.T, c, np_)
            # SupCon masks are {0,1}: stream them as int8 (4x less DMA than f32).
            mask_p = _pad_to(mask, bp, np_).astype(jnp.int8)
            grid = (bp // tb, np_ // tn)
            kernel = functools.partial(
                _supcon_mask_kernel,
                temperature=self.temperature,
                base_temperature=self.base_temperature,
                n_valid=n)
            row_loss = pl.pallas_call(
                kernel,
                out_shape=jax.ShapeDtypeStruct((bp, 1), jnp.float32),
                grid_spec=pltpu.PrefetchScalarGridSpec(
                    num_scalar_prefetch=0,
                    grid=grid,
                    in_specs=[
                        pl.BlockSpec((tb, c), lambda bi, j: (bi, 0)),   # anchor (resident per bi)
                        pl.BlockSpec((c, tn), lambda bi, j: (0, j)),    # streamed features^T
                        pl.BlockSpec((tb, tn), lambda bi, j: (bi, j)),  # streamed int8 mask
                    ],
                    out_specs=pl.BlockSpec((tb, 1), lambda bi, j: (bi, 0)),
                    scratch_shapes=[pltpu.VMEM((tb, 1), jnp.float32)
                                    for _ in range(4)],
                ),
                compiler_params=self._compiler_params(),
            )(anchor_p, feats_t_p, mask_p)
            return jnp.mean(row_loss[:b, 0])
        else:
            # TODO(synk): when 2*batch_size is tile-aligned, q/queue could be read
            # straight out of `features` via index_map row offsets instead of XLA
            # slices; the (C,K) transpose below already forces one copy of queue.
            q = features[:batch_size]
            k = features[batch_size:batch_size * 2]
            queue = features[batch_size * 2:]
            b = q.shape[0]
            kq = queue.shape[0]
            tb, bp = _tile_and_pad(b, self.block_rows, _row_align(features.dtype),
                                   self.min_row_blocks)
            tk, kp = _tile_and_pad(kq, self.block_cols, 128)
            q_p = _pad_to(q, bp)
            # l_pos in the wrapper (cheap fused row-wise op): avoids holding a
            # double-buffered k tile in VMEM that is only read at j == 0.
            l_pos = jnp.sum(q.astype(jnp.float32) * k.astype(jnp.float32),
                            axis=1, keepdims=True) / self.temperature
            l_pos_p = _pad_to(l_pos, bp)
            queue_t_p = _pad_to(queue.T, c, kp)
            grid = (bp // tb, kp // tk)
            kernel = functools.partial(
                _supcon_infonce_kernel,
                temperature=self.temperature,
                k_valid=kq)
            row_loss = pl.pallas_call(
                kernel,
                out_shape=jax.ShapeDtypeStruct((bp, 1), jnp.float32),
                grid_spec=pltpu.PrefetchScalarGridSpec(
                    num_scalar_prefetch=0,
                    grid=grid,
                    in_specs=[
                        pl.BlockSpec((tb, c), lambda bi, j: (bi, 0)),   # q (resident per bi)
                        pl.BlockSpec((tb, 1), lambda bi, j: (bi, 0)),   # l_pos (resident per bi)
                        pl.BlockSpec((c, tk), lambda bi, j: (0, j)),    # streamed queue^T
                    ],
                    out_specs=pl.BlockSpec((tb, 1), lambda bi, j: (bi, 0)),
                    scratch_shapes=[pltpu.VMEM((tb, 1), jnp.float32)
                                    for _ in range(2)],
                ),
                compiler_params=self._compiler_params(),
            )(q_p, l_pos_p, queue_t_p)
            return jnp.mean(row_loss[:b, 0])


# -----------------------------------------------------------------------------
# Pure-JAX references (verification)
# -----------------------------------------------------------------------------
def _ref_mask(features, mask, batch_size, t, bt):
    f = features.astype(jnp.float32)
    anchor = f[:batch_size]
    adc = (anchor @ f.T) / t
    logits = adc - jnp.max(adc, axis=1, keepdims=True)
    b, n = mask.shape
    lm = 1.0 - (jnp.arange(n)[None, :] == jnp.arange(b)[:, None]).astype(jnp.float32)
    m = mask.astype(jnp.float32) * lm
    exp_logits = jnp.exp(logits) * lm
    log_prob = logits - jnp.log(exp_logits.sum(1, keepdims=True) + 1e-12)
    mlpp = (m * log_prob).sum(1) / m.sum(1)
    return jnp.mean(-(t / bt) * mlpp)


def _ref_infonce(features, batch_size, t):
    f = features.astype(jnp.float32)
    q = f[:batch_size]
    k = f[batch_size:batch_size * 2]
    queue = f[batch_size * 2:]
    l_pos = jnp.sum(q * k, axis=1, keepdims=True)
    l_neg = q @ queue.T
    logits = jnp.concatenate([l_pos, l_neg], axis=1) / t
    return jnp.mean(jax.nn.logsumexp(logits, axis=1) - logits[:, 0])


# -----------------------------------------------------------------------------
if __name__ == "__main__":
    key = jax.random.PRNGKey(0)
    t = 0.07
    # Tolerance covers XLA-reference vs MXU-kernel matmul precision differences
    # (the kernel epilogue itself now uses an exact divide).
    tol = dict(rtol=5e-3, atol=5e-3)

    k0, k1, k2 = jax.random.split(key, 3)

    # ---- tiny shapes (single tile per axis, padded lanes) ----
    n0, c0, b0 = 8, 32, 4
    feats0 = jax.random.normal(k0, (n0, c0), jnp.float32)
    feats0 = feats0 / jnp.linalg.norm(feats0, axis=1, keepdims=True)
    labels0 = jnp.array([0, 1, 0, 1, 0, 1, 0, 1], jnp.int32)
    mask0 = (labels0[:b0, None] == labels0[None, :]).astype(jnp.float32)

    loss_fn = SupConLoss(temperature=t, base_temperature=t)

    out = jax.block_until_ready(loss_fn(feats0, mask=mask0, batch_size=b0))
    ref = _ref_mask(feats0, mask0, b0, t, t)
    assert jnp.isfinite(out), out
    assert jnp.allclose(out, ref, **tol), (out, ref)

    out = jax.block_until_ready(loss_fn(feats0, mask=None, batch_size=2))
    ref = _ref_infonce(feats0, 2, t)
    assert jnp.isfinite(out), out
    assert jnp.allclose(out, ref, **tol), (out, ref)

    # ---- multi-tile / padded-last-tile path: exercises the streaming LSE, the
    #      guarded diagonal/validity masking and the parallel row-block axis ----
    n1, c1, b1 = 200, 128, 16
    feats1 = jax.random.normal(k1, (n1, c1), jnp.float32)
    feats1 = feats1 / jnp.linalg.norm(feats1, axis=1, keepdims=True)
    labels1 = jax.random.randint(k2, (n1,), 0, 4)
    mask1 = (labels1[:b1, None] == labels1[None, :]).astype(jnp.float32)

    loss_fn_tiled = SupConLoss(temperature=t, base_temperature=t,
                               block_rows=8, block_cols=128)

    out = jax.block_until_ready(loss_fn_tiled(feats1, mask=mask1, batch_size=b1))
    ref = _ref_mask(feats1, mask1, b1, t, t)
    assert jnp.isfinite(out), out
    assert jnp.allclose(out, ref, **tol), (out, ref)

    out = jax.block_until_ready(loss_fn_tiled(feats1, mask=None, batch_size=b1))
    ref = _ref_infonce(feats1, b1, t)
    assert jnp.isfinite(out), out
    assert jnp.allclose(out, ref, **tol), (out, ref)

    print("KERNEL_OK")
</pallas_src>

<mosaic_0001>
module attributes {stable_mosaic.version = 11 : i64} {
  func.func @_supcon_mask_kernel(%arg0: i32, %arg1: i32, %arg2: memref<8x32xf32, #tpu.memory_space<vmem>>, %arg3: memref<32x128xf32, #tpu.memory_space<vmem>>, %arg4: memref<8x128xi8, #tpu.memory_space<vmem>>, %arg5: memref<8x1xf32, #tpu.memory_space<vmem>>, %arg6: memref<8x1xf32, #tpu.memory_space<vmem>>, %arg7: memref<8x1xf32, #tpu.memory_space<vmem>>, %arg8: memref<8x1xf32, #tpu.memory_space<vmem>>, %arg9: memref<8x1xf32, #tpu.memory_space<vmem>>) attributes {dimension_semantics = [#tpu.dimension_semantics<parallel>, #tpu.dimension_semantics<arbitrary>], iteration_bounds = array<i64: 1, 1>, scalar_prefetch = 0 : i64, scratch_operands = 4 : i64, tpu.core_type = #tpu.core_type<tc>, window_params = [{transform_indices = @transform_0, window_bounds = array<i64: 8, 32>}, {transform_indices = @transform_1, window_bounds = array<i64: 32, 128>}, {transform_indices = @transform_2, window_bounds = array<i64: 8, 128>}, {transform_indices = @transform_3, window_bounds = array<i64: 8, 1>}]} {
    %c8_i32 = arith.constant 8 : i32
    %0 = arith.muli %arg0, %c8_i32 : i32
    %c128_i32 = arith.constant 128 : i32
    %1 = arith.muli %arg1, %c128_i32 : i32
    %c0_i32 = arith.constant 0 : i32
    %2 = arith.cmpi eq, %arg1, %c0_i32 : i32
    %3 = arith.extui %2 : i1 to i32
    %c0_i32_0 = arith.constant 0 : i32
    %4 = arith.cmpi ne, %3, %c0_i32_0 : i32
    scf.if %4 {
      %cst_20 = arith.constant 0xFF800000 : f32
      %38 = vector.broadcast %cst_20 : f32 to vector<8x1xf32>
      %c0_21 = arith.constant 0 : index
      %c0_22 = arith.constant 0 : index
      %39 = vector.load %arg6[%c0_21, %c0_22] : memref<8x1xf32, #tpu.memory_space<vmem>>, vector<8x1xf32>
      tpu.vector_store %arg6[%c0_21, %c0_22], %38 {strides = array<i32>} : memref<8x1xf32, #tpu.memory_space<vmem>>, vector<8x1xf32>,
      %cst_23 = arith.constant 0.000000e+00 : f32
      %40 = vector.broadcast %cst_23 : f32 to vector<8x1xf32>
      %c0_24 = arith.constant 0 : index
      %c0_25 = arith.constant 0 : index
      %41 = vector.load %arg7[%c0_24, %c0_25] : memref<8x1xf32, #tpu.memory_space<vmem>>, vector<8x1xf32>
      tpu.vector_store %arg7[%c0_24, %c0_25], %40 {strides = array<i32>} : memref<8x1xf32, #tpu.memory_space<vmem>>, vector<8x1xf32>,
      %cst_26 = arith.constant 0.000000e+00 : f32
      %42 = vector.broadcast %cst_26 : f32 to vector<8x1xf32>
      %c0_27 = arith.constant 0 : index
      %c0_28 = arith.constant 0 : index
      %43 = vector.load %arg8[%c0_27, %c0_28] : memref<8x1xf32, #tpu.memory_space<vmem>>, vector<8x1xf32>
      tpu.vector_store %arg8[%c0_27, %c0_28], %42 {strides = array<i32>} : memref<8x1xf32, #tpu.memory_space<vmem>>, vector<8x1xf32>,
      %cst_29 = arith.constant 0.000000e+00 : f32
      %44 = vector.broadcast %cst_29 : f32 to vector<8x1xf32>
      %c0_30 = arith.constant 0 : index
      %c0_31 = arith.constant 0 : index
      %45 = vector.load %arg9[%c0_30, %c0_31] : memref<8x1xf32, #tpu.memory_space<vmem>>, vector<8x1xf32>
      tpu.vector_store %arg9[%c0_30, %c0_31], %44 {strides = array<i32>} : memref<8x1xf32, #tpu.memory_space<vmem>>, vector<8x1xf32>,
    } else {
    }
    %c0 = arith.constant 0 : index
    %c0_1 = arith.constant 0 : index
    %5 = vector.load %arg2[%c0, %c0_1] : memref<8x32xf32, #tpu.memory_space<vmem>>, vector<8x32xf32>
    %cst = arith.constant 14.2857141 : f32
    %6 = vector.broadcast %cst : f32 to vector<8x32xf32>
    %7 = arith.mulf %5, %6 : vector<8x32xf32>
    %c0_2 = arith.constant 0 : index
    %c0_3 = arith.constant 0 : index
    %8 = vector.load %arg3[%c0_2, %c0_3] : memref<32x128xf32, #tpu.memory_space<vmem>>, vector<32x128xf32>
    %cst_4 = arith.constant dense<0.000000e+00> : vector<8x128xf32>
    %9 = tpu.matmul %7, %8, %cst_4 {dimension_numbers = #tpu.dot_dimension_numbers<[1], [0], [0], [1], [0, 0, 1, 1], [], []>} : vector<8x32xf32>, vector<32x128xf32>, vector<8x128xf32> -> vector<8x128xf32>
    %c0_5 = arith.constant 0 : index
    %c0_6 = arith.constant 0 : index
    %10 = vector.load %arg4[%c0_5, %c0_6] : memref<8x128xi8, #tpu.memory_space<vmem>>, vector<8x128xi8>
    %11 = arith.sitofp %10 : vector<8x128xi8> to vector<8x128xf32>
    %c0_7 = arith.constant 0 : index
    %c0_8 = arith.constant 0 : index
    %12 = vector.load %arg6[%c0_7, %c0_8] : memref<8x1xf32, #tpu.memory_space<vmem>>, vector<8x1xf32>
    %cst_9 = arith.constant dense<0xFF800000> : vector<8xf32>
    %13 = vector.multi_reduction <maximumf>, %9, %cst_9 [1] : vector<8x128xf32> to vector<8xf32>
    %14 = vector.shape_cast %13 : vector<8xf32> to vector<8x1xf32>
    %15 = arith.maximumf %12, %14 : vector<8x1xf32>
    %16 = arith.subf %12, %15 : vector<8x1xf32>
    %17 = math.exp %16 : vector<8x1xf32>
    %18 = vector.broadcast %15 : vector<8x1xf32> to vector<8x128xf32>
    %19 = arith.subf %9, %18 : vector<8x128xf32>
    %20 = math.exp %19 : vector<8x128xf32>
    %c8_i32_10 = arith.constant 8 : i32
    %21 = arith.addi %0, %c8_i32_10 : i32
    %22 = arith.cmpi slt, %1, %21 : i32
    %c128_i32_11 = arith.constant 128 : i32
    %23 = arith.addi %1, %c128_i32_11 : i32
    %24 = arith.cmpi slt, %0, %23 : i32
    %25 = arith.andi %22, %24 : i1
    %c128_i32_12 = arith.constant 128 : i32
    %26 = arith.addi %1, %c128_i32_12 : i32
    %c8_i32_13 = arith.constant 8 : i32
    %27 = arith.cmpi sgt, %26, %c8_i32_13 : i32
    %28 = arith.ori %25, %27 : i1
    %29 = arith.extui %28 : i1 to i32
    %c0_i32_14 = arith.constant 0 : i32
    %30 = arith.cmpi ne, %29, %c0_i32_14 : i32
    scf.if %30 {
      %38 = tpu.iota {dimensions = array<i32: 0>} : vector<8x128xi32>
      %39 = vector.broadcast %0 : i32 to vector<8x128xi32>
      %40 = arith.addi %39, %38 : vector<8x128xi32>
      %41 = tpu.iota {dimensions = array<i32: 1>} : vector<8x128xi32>
      %42 = vector.broadcast %1 : i32 to vector<8x128xi32>
      %43 = arith.addi %42, %41 : vector<8x128xi32>
      %44 = arith.cmpi ne, %40, %43 : vector<8x128xi32>
      %c8_i32_20 = arith.constant 8 : i32
      %45 = vector.broadcast %c8_i32_20 : i32 to vector<8x128xi32>
      %46 = arith.cmpi slt, %43, %45 : vector<8x128xi32>
      %47 = arith.andi %44, %46 : vector<8x128xi1>
      %cst_21 = arith.constant 0.000000e+00 : f32
      %48 = vector.broadcast %cst_21 : f32 to vector<8x128xf32>
      %49 = arith.select %47, %11, %48 : vector<8x128xi1>, vector<8x128xf32>
      %c0_22 = arith.constant 0 : index
      %c0_23 = arith.constant 0 : index
      %50 = vector.load %arg7[%c0_22, %c0_23] : memref<8x1xf32, #tpu.memory_space<vmem>>, vector<8x1xf32>
      %51 = arith.mulf %50, %17 : vector<8x1xf32>
      %cst_24 = arith.constant 0.000000e+00 : f32
      %52 = vector.broadcast %cst_24 : f32 to vector<8x128xf32>
      %53 = arith.select %47, %20, %52 : vector<8x128xi1>, vector<8x128xf32>
      %cst_25 = arith.constant dense<0.000000e+00> : vector<8xf32>
      %54 = vector.multi_reduction <add>, %53, %cst_25 [1] : vector<8x128xf32> to vector<8xf32>
      %55 = vector.shape_cast %54 : vector<8xf32> to vector<8x1xf32>
      %56 = arith.addf %51, %55 : vector<8x1xf32>
      %c0_26 = arith.constant 0 : index
      %c0_27 = arith.constant 0 : index
      %57 = vector.load %arg7[%c0_26, %c0_27] : memref<8x1xf32, #tpu.memory_space<vmem>>, vector<8x1xf32>
      tpu.vector_store %arg7[%c0_26, %c0_27], %56 {strides = array<i32>} : memref<8x1xf32, #tpu.memory_space<vmem>>, vector<8x1xf32>,
      %c0_28 = arith.constant 0 : index
      %c0_29 = arith.constant 0 : index
      %58 = vector.load %arg8[%c0_28, %c0_29] : memref<8x1xf32, #tpu.memory_space<vmem>>, vector<8x1xf32>
      %59 = arith.mulf %49, %9 : vector<8x128xf32>
      %cst_30 = arith.constant dense<0.000000e+00> : vector<8xf32>
      %60 = vector.multi_reduction <add>, %59, %cst_30 [1] : vector<8x128xf32> to vector<8xf32>
      %61 = vector.shape_cast %60 : vector<8xf32> to vector<8x1xf32>
      %62 = arith.addf %58, %61 : vector<8x1xf32>
      %c0_31 = arith.constant 0 : index
      %c0_32 = arith.constant 0 : index
      %63 = vector.load %arg8[%c0_31, %c0_32] : memref<8x1xf32, #tpu.memory_space<vmem>>, vector<8x1xf32>
      tpu.vector_store %arg8[%c0_31, %c0_32], %62 {strides = array<i32>} : memref<8x1xf32, #tpu.memory_space<vmem>>, vector<8x1xf32>,
      %c0_33 = arith.constant 0 : index
      %c0_34 = arith.constant 0 : index
      %64 = vector.load %arg9[%c0_33, %c0_34] : memref<8x1xf32, #tpu.memory_space<vmem>>, vector<8x1xf32>
      %cst_35 = arith.constant dense<0.000000e+00> : vector<8xf32>
      %65 = vector.multi_reduction <add>, %49, %cst_35 [1] : vector<8x128xf32> to vector<8xf32>
      %66 = vector.shape_cast %65 : vector<8xf32> to vector<8x1xf32>
      %67 = arith.addf %64, %66 : vector<8x1xf32>
      %c0_36 = arith.constant 0 : index
      %c0_37 = arith.constant 0 : index
      %68 = vector.load %arg9[%c0_36, %c0_37] : memref<8x1xf32, #tpu.memory_space<vmem>>, vector<8x1xf32>
      tpu.vector_store %arg9[%c0_36, %c0_37], %67 {strides = array<i32>} : memref<8x1xf32, #tpu.memory_space<vmem>>, vector<8x1xf32>,
    } else {
    }
    %true = arith.constant true
    %31 = arith.xori %28, %true : i1
    %32 = arith.extui %31 : i1 to i32
    %c0_i32_15 = arith.constant 0 : i32
    %33 = arith.cmpi ne, %32, %c0_i32_15 : i32
    scf.if %33 {
      %c0_20 = arith.constant 0 : index
      %c0_21 = arith.constant 0 : index
      %38 = vector.load %arg7[%c0_20, %c0_21] : memref<8x1xf32, #tpu.memory_space<vmem>>, vector<8x1xf32>
      %39 = arith.mulf %38, %17 : vector<8x1xf32>
      %cst_22 = arith.constant dense<0.000000e+00> : vector<8xf32>
      %40 = vector.multi_reduction <add>, %20, %cst_22 [1] : vector<8x128xf32> to vector<8xf32>
      %41 = vector.shape_cast %40 : vector<8xf32> to vector<8x1xf32>
      %42 = arith.addf %39, %41 : vector<8x1xf32>
      %c0_23 = arith.constant 0 : index
      %c0_24 = arith.constant 0 : index
      %43 = vector.load %arg7[%c0_23, %c0_24] : memref<8x1xf32, #tpu.memory_space<vmem>>, vector<8x1xf32>
      tpu.vector_store %arg7[%c0_23, %c0_24], %42 {strides = array<i32>} : memref<8x1xf32, #tpu.memory_space<vmem>>, vector<8x1xf32>,
      %c0_25 = arith.constant 0 : index
      %c0_26 = arith.constant 0 : index
      %44 = vector.load %arg8[%c0_25, %c0_26] : memref<8x1xf32, #tpu.memory_space<vmem>>, vector<8x1xf32>
      %45 = arith.mulf %11, %9 : vector<8x128xf32>
      %cst_27 = arith.constant dense<0.000000e+00> : vector<8xf32>
      %46 = vector.multi_reduction <add>, %45, %cst_27 [1] : vector<8x128xf32> to vector<8xf32>
      %47 = vector.shape_cast %46 : vector<8xf32> to vector<8x1xf32>
      %48 = arith.addf %44, %47 : vector<8x1xf32>
      %c0_28 = arith.constant 0 : index
      %c0_29 = arith.constant 0 : index
      %49 = vector.load %arg8[%c0_28, %c0_29] : memref<8x1xf32, #tpu.memory_space<vmem>>, vector<8x1xf32>
      tpu.vector_store %arg8[%c0_28, %c0_29], %48 {strides = array<i32>} : memref<8x1xf32, #tpu.memory_space<vmem>>, vector<8x1xf32>,
      %c0_30 = arith.constant 0 : index
      %c0_31 = arith.constant 0 : index
      %50 = vector.load %arg9[%c0_30, %c0_31] : memref<8x1xf32, #tpu.memory_space<vmem>>, vector<8x1xf32>
      %cst_32 = arith.constant dense<0.000000e+00> : vector<8xf32>
      %51 = vector.multi_reduction <add>, %11, %cst_32 [1] : vector<8x128xf32> to vector<8xf32>
      %52 = vector.shape_cast %51 : vector<8xf32> to vector<8x1xf32>
      %53 = arith.addf %50, %52 : vector<8x1xf32>
      %c0_33 = arith.constant 0 : index
      %c0_34 = arith.constant 0 : index
      %54 = vector.load %arg9[%c0_33, %c0_34] : memref<8x1xf32, #tpu.memory_space<vmem>>, vector<8x1xf32>
      tpu.vector_store %arg9[%c0_33, %c0_34], %53 {strides = array<i32>} : memref<8x1xf32, #tpu.memory_space<vmem>>, vector<8x1xf32>,
    } else {
    }
    %c0_16 = arith.constant 0 : index
    %c0_17 = arith.constant 0 : index
    %34 = vector.load %arg6[%c0_16, %c0_17] : memref<8x1xf32, #tpu.memory_space<vmem>>, vector<8x1xf32>
    tpu.vector_store %arg6[%c0_16, %c0_17], %15 {strides = array<i32>} : memref<8x1xf32, #tpu.memory_space<vmem>>, vector<8x1xf32>,
    %c0_i32_18 = arith.constant 0 : i32
    %35 = arith.cmpi eq, %arg1, %c0_i32_18 : i32
    %36 = arith.extui %35 : i1 to i32
    %c0_i32_19 = arith.constant 0 : i32
    %37 = arith.cmpi ne, %36, %c0_i32_19 : i32
    scf.if %37 {
      %c0_20 = arith.constant 0 : index
      %c0_21 = arith.constant 0 : index
      %38 = vector.load %arg7[%c0_20, %c0_21] : memref<8x1xf32, #tpu.memory_space<vmem>>, vector<8x1xf32>
      %cst_22 = arith.constant 9.99999996E-13 : f32
      %39 = vector.broadcast %cst_22 : f32 to vector<8x1xf32>
      %40 = arith.addf %38, %39 : vector<8x1xf32>
      %41 = math.log %40 : vector<8x1xf32>
      %c0_23 = arith.constant 0 : index
      %c0_24 = arith.constant 0 : index
      %42 = vector.load %arg8[%c0_23, %c0_24] : memref<8x1xf32, #tpu.memory_space<vmem>>, vector<8x1xf32>
      %c0_25 = arith.constant 0 : index
      %c0_26 = arith.constant 0 : index
      %43 = vector.load %arg9[%c0_25, %c0_26] : memref<8x1xf32, #tpu.memory_space<vmem>>, vector<8x1xf32>
      %c0_27 = arith.constant 0 : index
      %c0_28 = arith.constant 0 : index
      %44 = vector.load %arg6[%c0_27, %c0_28] : memref<8x1xf32, #tpu.memory_space<vmem>>, vector<8x1xf32>
      %45 = arith.addf %44, %41 : vector<8x1xf32>
      %46 = arith.mulf %43, %45 : vector<8x1xf32>
      %47 = arith.subf %42, %46 : vector<8x1xf32>
      %c0_29 = arith.constant 0 : index
      %c0_30 = arith.constant 0 : index
      %48 = vector.load %arg9[%c0_29, %c0_30] : memref<8x1xf32, #tpu.memory_space<vmem>>, vector<8x1xf32>
      %49 = arith.divf %47, %48 : vector<8x1xf32>
      %cst_31 = arith.constant -1.000000e+00 : f32
      %50 = vector.broadcast %cst_31 : f32 to vector<8x1xf32>
      %51 = arith.mulf %50, %49 : vector<8x1xf32>
      %c0_32 = arith.constant 0 : index
      %c0_33 = arith.constant 0 : index
      %52 = vector.load %arg5[%c0_32, %c0_33] : memref<8x1xf32, #tpu.memory_space<vmem>>, vector<8x1xf32>
      tpu.vector_store %arg5[%c0_32, %c0_33], %51 {strides = array<i32>} : memref<8x1xf32, #tpu.memory_space<vmem>>, vector<8x1xf32>,
    } else {
    }
    return
  }
  func.func @transform_0(%arg0: i32, %arg1: i32) -> (i32, i32) {
    %c0_i32 = arith.constant 0 : i32
    %c0_i32_0 = arith.constant 0 : i32
    return %arg0, %c0_i32 : i32, i32
  }
  func.func @transform_1(%arg0: i32, %arg1: i32) -> (i32, i32) {
    %c0_i32 = arith.constant 0 : i32
    %c0_i32_0 = arith.constant 0 : i32
    return %c0_i32, %arg1 : i32, i32
  }
  func.func @transform_2(%arg0: i32, %arg1: i32) -> (i32, i32) {
    %c0_i32 = arith.constant 0 : i32
    return %arg0, %arg1 : i32, i32
  }
  func.func @transform_3(%arg0: i32, %arg1: i32) -> (i32, i32) {
    %c0_i32 = arith.constant 0 : i32
    %c0_i32_0 = arith.constant 0 : i32
    return %arg0, %c0_i32 : i32, i32
  }
}

</mosaic_0001>

<bundles_post_ra>
// kernel: tpu_custom_call.1
= control target key start
LH: loop header
LB: loop body
LE: loop exit
PB: predicated region body
PF: predicated region fallthrough
CT: control target
= control target key end

     0   :  { %8 = vsyncpa [#allocation7], 0  ;;  %s364_s0 = inlined_call_operand.hbm [shape: f32[8,32], index: 0, kind: input, shape index: {}]   ;;  %s365_s1 = inlined_call_operand.hbm [shape: f32[32,128], index: 1, kind: input, shape index: {}]   ;;  %s366_s2 = inlined_call_operand.vmem [shape: s8[8,128], index: 2, kind: input, shape index: {}]   ;;  %s367_s3 = inlined_call_operand.vmem [shape: f32[8,1], index: 3, kind: output, shape index: {}]  }
   0x1   :  { %9 = vsyncpa [#allocation9], 0  ;;  %s315_s12 = smov [#allocation6]   ;;  %s316_s14 = smov [#allocation8]  }
   0x2   :  { %s16_s13 = sshll.u32 %s315_s12, 4  ;;  %s25_s15 = sshll.u32 %s316_s14, 4  ;;  %s17_s13 = int_to_ptr.vmem [resolvable:$true] %s16_s13  ;;  %s26_s15 = int_to_ptr.vmem [resolvable:$true] %s25_s15 }
   0x3   :  { %s279_s16 = scalar_lea.vmem %s17_s13, 128  ;;  %p284_p1 = scmp.lt.s32.totalorder %s17_s13, %s17_s13 }
   0x4   :  { %p280_p0 = scmp.ne.s32.totalorder %s17_s13, %s279_s16  ;;  %p285_p2 = scmp.lt.s32.totalorder %s279_s16, %s279_s16 }
   0x6   :  { %p286_p3 = por %p285_p2, %p284_p1 }
   0x8   :  { %p287_p4 = pnand %p286_p3, %p280_p0 }
   0xa   :  { %290 = shalt.err (!%p287_p4)
}
   0xb   :  { %19 = dma.hbm_to_vmem [thread:$0]  %s364_s0, 128, %s17_s13, [#allocation7]  }
   0xc   :  { %s299_s19 = scalar_lea.vmem %s26_s15, 512  ;;  %p304_p6 = scmp.lt.s32.totalorder %s26_s15, %s26_s15 }
   0xd   :  { %p300_p5 = scmp.ne.s32.totalorder %s26_s15, %s299_s19  ;;  %p305_p7 = scmp.lt.s32.totalorder %s299_s19, %s299_s19 }
   0xf   :  { %p306_p8 = por %p305_p7, %p304_p6 }
  0x11   :  { %p307_p9 = pnand %p306_p8, %p300_p5 }
  0x13   :  { %310 = shalt.err (!%p307_p9)
}
  0x14   :  { %s317_s20 = smov 128   ;;  %s318_s21 = smov 8  }
  0x15   :  { %31 = dma.hbm_to_vmem [thread:$0]  %s365_s1, 512, %s26_s15, [#allocation9], %s317_s20, %s317_s20, %s318_s21  }
  0x16   :  { %311 = dma.done.wait [#allocation7], 128  }
  0x17   :  { %312 = vsyncadd [#allocation7], 4294967168 }
  0x18   :  { %313 = dma.done.wait [#allocation9], 512  }
  0x19   :  { %314 = vsyncadd [#allocation9], 4294966784  ;;  %v319_v0 = vmov 0.0   ;;  %vm320_vm0 = vmmov 0   ;;  %v56_v1 = vld [vmem:[#allocation8 + $0x18] sm:$0xff]  ;;  %v55_v2 = vld [vmem:[#allocation8 + $0x10] sm:$0xff]  ;;  %v160_v18 = vlaneseq }
  0x1a   :  { %243 = vmatprep.subr.mxu0 %v319_v0  ;;  %251 = vmatprep.mubr.msk.f32.mxu0 %vm320_vm0, %v319_v0  ;;  %v51_v3 = vld [vmem:[#allocation6] sm:$0xff]  ;;  %v54_v4 = vld [vmem:[#allocation8 + $0x8] sm:$0xff]  ;;  %v53_v5 = vld [vmem:[#allocation8] sm:$0xff]  ;;  %vm57_vm1 = vcmask 261120   ;;  %vm46_vm2 = vcmask 7168   ;;  %v321_v7 = vmov -inf  }
  0x1b   :  { %244 = vmatpush3.msra.mxu0 %v56_v1  ;;  %v52_v6 = vmul.f32 14.285714, %v51_v3  ;;  %47 = vst.msk [vmem:[#allocation2] sm:$0xff] %vm46_vm2, %v321_v7  ;;  %48 = vst.msk [vmem:[#allocation3] sm:$0xff] %vm46_vm2, %v319_v0  ;;  %v322_v10 = vmov 0   ;;  %v161_v19 = vshrl.u32 %v160_v18, 7 }
  0x1c   :  { %245 = vmatprep.subr.mxu0 %v319_v0  ;;  %49 = vst.msk [vmem:[#allocation4] sm:$0xff] %vm46_vm2, %v319_v0  ;;  %50 = vst.msk [vmem:[#allocation5] sm:$0xff] %vm46_vm2, %v319_v0  ;;  %262 = vset.pattern.permute.xlu0 %v322_v10  ;;  %v165_v20 = vand.u32 127, %v160_v18  ;;  %v131_v21 = vld [vmem:[%s366_s2] sm:$0x3] }
  0x1d   :  { %246 = vmatpush3.msra.mxu0 %v55_v2  ;;  %v132_v22 = vunpack.c.0.s8 %v131_v21 }
  0x1e   :  { %247 = vmatprep.subr.mxu0 %v319_v0  ;;  %vm168_vm3 = vcmp.ne.s32.totalorder %v161_v19, %v165_v20  ;;  %vm169_vm4 = vcmp.lt.s32.totalorder %v165_v20, 8 }
  0x1f   :  { %248 = vmatpush3.msra.mxu0 %v54_v4  ;;  %vm170_vm5 = vmand %vm168_vm3, %vm169_vm4  ;;  %v133_v25 = vcvt.s32.f32 %v132_v22 }
  0x20   :  { %249 = vmatprep.subr.mxu0 %v319_v0 }
  0x21   :  { %250 = vmatpush3.msra.mxu0 %v53_v5  ;;  %v171_v26 = vsel %vm170_vm5, %v133_v25, 0.0 }
  0x22   :  { %252 = vmatmul.mubr.msk.f32.vlgmr.msra.gmra.mxu0 %vm57_vm1, %v52_v6  ;;  %v134_v11 = vld [vmem:[#allocation2] sm:$0xff]  ;;  %v172_v30 = vld [vmem:[#allocation3] sm:$0xff] }
  0x23   :  { %v186_v34 = vld [vmem:[#allocation5] sm:$0xff]  ;;  %v180_v37 = vld [vmem:[#allocation4] sm:$0xff] }
  0xe2   :  { %v127_v8 = vpop.f32.mrf.mxu0 }
  0xe3   :  { %135 = vmax.xlane.f32.xlu0 %v127_v8  ;;  %v181_v27 = vmul.f32 %v171_v26, %v127_v8 }
  0xe4   :  { %v253_v9 = vpop.f32.mrf.mxu0 }
 0x16c   :  { %v136_v12 = vpop.xlane.xlu0 %135 }
 0x16d   :  { %v137_v13 = vmax.f32 %v134_v11, %v136_v12 }
 0x16f   :  { %v138_v14 = vsub.f32 %v134_v11, %v137_v13  ;;  %213 = vst.msk [vmem:[#allocation2] sm:$0xff] %vm46_vm2, %v137_v13  ;;  %143 = vperm.xlu0 %262, %v137_v13  }
 0x171   :  { %v139_v28 = vmul.f32 1.442695, %v138_v14 }
 0x176   :  { %v223_v45 = vld [vmem:[#allocation2] sm:$0xff] }
 0x1ea   :  { %v144_v15 = vpop.permute.xlu0 %143 }
 0x1eb   :  { %v146_v16 = vsub.f32 %v127_v8, %v144_v15 }
 0x1ed   :  { %v147_v17 = vmul.f32 1.442695, %v146_v16 }
 0x1ef   :  { %263 = vpow2.f32 %v147_v17 }
 0x1f0   :  { %265 = vpow2.f32 %v139_v28 }
 0x1fc   :  { %v264_v23 = vpop.eup %263 }
 0x1fd   :  { %v174_v24 = vsel %vm170_vm5, %v264_v23, 0.0  ;;  %v266_v29 = vpop.eup %265 }
 0x1fe   :  { %175 = vadd.xlane.f32.xlu1 %v174_v24  ;;  %v173_v31 = vmul.f32 %v266_v29, %v172_v30 }
 0x202   :  { %187 = vadd.xlane.f32.xlu1 %v171_v26 }
 0x206   :  { %182 = vadd.xlane.f32.xlu1 %v181_v27 }
 0x287   :  { %v176_v32 = vpop.xlane.xlu1 %175 }
 0x288   :  { %v177_v33 = vadd.f32 %v176_v32, %v173_v31 }
 0x28a   :  { %179 = vst.msk [vmem:[#allocation3] sm:$0xff] %vm46_vm2, %v177_v33 }
 0x28b   :  { %v188_v35 = vpop.xlane.xlu1 %187 }
 0x28c   :  { %v189_v36 = vadd.f32 %v188_v35, %v186_v34 }
 0x28e   :  { %190 = vst.msk [vmem:[#allocation5] sm:$0xff] %vm46_vm2, %v189_v36 }
 0x28f   :  { %v183_v38 = vpop.xlane.xlu1 %182 }
 0x290   :  { %v184_v39 = vadd.f32 %v183_v38, %v180_v37 }
 0x291   :  { %v217_v40 = vld [vmem:[#allocation3] sm:$0xff] }
 0x292   :  { %v218_v41 = vadd.f32 1e-12, %v217_v40  ;;  %185 = vst.msk [vmem:[#allocation4] sm:$0xff] %vm46_vm2, %v184_v39 }
 0x294   :  { %267 = vlog2.f32 %v218_v41 }
 0x295   :  { %v222_v42 = vld [vmem:[#allocation5] sm:$0xff] }
 0x296   :  { %269 = vrcp.f32 %v222_v42 }
 0x299   :  { %v221_v49 = vld [vmem:[#allocation4] sm:$0xff] }
 0x2a1   :  { %v268_v43 = vpop.eup %267 }
 0x2a2   :  { %v220_v44 = vmul.f32 0.6931472, %v268_v43 }
 0x2a3   :  { %v270_v48 = vpop.eup %269 }
 0x2a4   :  { %v224_v46 = vadd.f32 %v223_v45, %v220_v44 }
 0x2a6   :  { %v225_v47 = vmul.f32 %v224_v46, %v222_v42 }
 0x2a8   :  { %v226_v50 = vsub.f32 %v221_v49, %v225_v47 }
 0x2aa   :  { %v228_v51 = vmul.f32 %v270_v48, %v226_v50 }
 0x2ac   :  { %v229_v52 = vmul.f32 -1.0, %v228_v51 }
 0x2ae   :  { %230 = vst.msk [vmem:[%s367_s3] sm:$0xff] %vm46_vm2, %v229_v52 }
 0x2af   :  { %235 = vsyncpa [#allocation7], 1 }
 0x2b0   :  { %236 = vsyncpa [#allocation9], 1 }

</bundles_post_ra>
